<compile_context>
chip_gen: v7x
topology: tpu7x:2x2x1
jax: 0.10.0
libtpu: 0.0.40
codegen_flags: <defaults>
</compile_context>

<pallas_src>
import functools

import jax
import jax.numpy as jnp
from jax import lax
from jax.experimental import pallas as pl
from jax.experimental.pallas import tpu as pltpu

HIDDEN = 50      # fixed by the module: nn.LSTM(frame_size, 50)
GATE_PAD = 56    # H=50 zero-padded to a sublane-aligned (multiple of 8) slab
TILE_N = 2048    # flattened rows per grid step (multiple of 128; sweep 2048-4096)


def _round_up(x, m):
    return ((x + m - 1) // m) * m


def _gate_dtype_for_device():
    """bf16 gate nonlinearities on bf16-EUP chips (v6e/v7x); f32 elsewhere (v5e)."""
    try:
        kind = jax.devices()[0].device_kind.lower()
    except Exception:
        return jnp.float32
    if any(tag in kind for tag in ("v6", "v7")):
        return jnp.bfloat16
    return jnp.float32


def _lstm_fused_kernel(x_ref, w3_ref, b3_ref, wlin_ref, blin_ref, y_ref, *, gate_dtype):
    # x_ref:    (tile_n, F)    natural row-major input rows
    # w3_ref:   (3*Gp, F)      [W_i; W_g; W_o], each zero-padded to Gp rows
    # b3_ref:   (3*Gp, 1)      (b_ih + b_hh) for i/g/o, zero-padded
    # wlin_ref: (F, Gp)        Linear weight, zero-padded columns
    # blin_ref: (F, 1)
    # y_ref:    (tile_n, F)    natural row-major output rows
    gp = GATE_PAD
    x = x_ref[...]                                   # (tile_n, F) float32

    # Contract the shared F axis of W[g, f] and x[n, f] directly (rhs-transposed
    # matmul) so the result is (gate, tile_n): the big N dimension lands on the
    # lane axis => full-width vregs for the EUP/VPU gate math (the binding unit).
    dn = (((1,), (1,)), ((), ()))

    def pre_act(k):                                  # per-gate matmul -> EUP immediately
        w = w3_ref[k * gp:(k + 1) * gp, :]           # static, sublane-aligned slice
        b = b3_ref[k * gp:(k + 1) * gp, :]
        p = lax.dot_general(w, x, dn, preferred_element_type=jnp.float32) + b
        return p.astype(gate_dtype)                  # bf16 on v6e/v7x, f32 on v5e

    i_g = jax.nn.sigmoid(pre_act(0))                 # input gate
    g_g = jnp.tanh(pre_act(1))                       # cell candidate
    o_g = jax.nn.sigmoid(pre_act(2))                 # output gate
    # c_prev == 0, so the forget gate is dead (dropped host-side); c = i * g.
    h = o_g * jnp.tanh(i_g * g_g)                    # (Gp, tile_n); padded rows == 0

    y = jnp.dot(wlin_ref[...], h.astype(jnp.float32),
                preferred_element_type=jnp.float32) + blin_ref[...]   # (F, tile_n)
    # Small in-kernel transpose (XLU slot is idle while the EUP binds) so the
    # HBM output keeps the natural (N, F) layout -- no wrapper-side HBM pass.
    y_ref[...] = y.T.astype(y_ref.dtype)


def lstm_forward(x, w_ih, b_ih, b_hh, w_lin, b_lin, *, gate_dtype=None):
    """x: (B, T, F) float32 -> (B, T, F) float32."""
    B, T, F = x.shape
    H, Gp = HIDDEN, GATE_PAD
    N = B * T
    if gate_dtype is None:
        gate_dtype = _gate_dtype_for_device()

    # ---- host-side weight prep (tiny, fused by XLA) ----
    def pad_gate(w):  # (H, ...) -> (Gp, ...), zero-filled
        return jnp.pad(w, ((0, Gp - H),) + ((0, 0),) * (w.ndim - 1))

    bias = b_ih + b_hh
    w3 = jnp.concatenate([pad_gate(w_ih[0 * H:1 * H]),      # i
                          pad_gate(w_ih[2 * H:3 * H]),      # g
                          pad_gate(w_ih[3 * H:4 * H])],     # o
                         axis=0)                            # (3*Gp, F)
    b3 = jnp.concatenate([pad_gate(bias[0 * H:1 * H]),
                          pad_gate(bias[2 * H:3 * H]),
                          pad_gate(bias[3 * H:4 * H])],
                         axis=0).reshape(3 * Gp, 1)
    wlin_p = jnp.pad(w_lin, ((0, 0), (0, Gp - H)))          # (F, Gp)
    blin = b_lin.reshape(F, 1)

    # ---- natural (N, F) layout; tile over N, no full-array transpose/pad ----
    x2d = x.reshape(N, F)
    if N >= TILE_N:
        # Ragged last block (if any) is masked by Pallas: garbage input rows
        # stay confined to output rows whose writes are dropped.
        n_work, tile_n = N, TILE_N
    else:
        # Single block: round up to a lane-aligned width (tiny zero pad).
        n_work = _round_up(N, 128)
        tile_n = n_work
        if n_work != N:
            x2d = jnp.pad(x2d, ((0, n_work - N), (0, 0)))
    grid = (pl.cdiv(n_work, tile_n),)

    cost = pl.CostEstimate(
        flops=2 * n_work * F * (3 * Gp) + 2 * n_work * Gp * F,
        transcendentals=4 * n_work * Gp,
        bytes_accessed=(2 * n_work * F + w3.size + b3.size
                        + wlin_p.size + blin.size) * 4,
    )

    y2d = pl.pallas_call(
        functools.partial(_lstm_fused_kernel, gate_dtype=gate_dtype),
        out_shape=jax.ShapeDtypeStruct((n_work, F), jnp.float32),
        grid=grid,
        in_specs=[
            pl.BlockSpec((tile_n, F), lambda i: (i, 0)),    # x rows, natural layout
            pl.BlockSpec((3 * Gp, F), lambda i: (0, 0)),    # resident weights
            pl.BlockSpec((3 * Gp, 1), lambda i: (0, 0)),
            pl.BlockSpec((F, Gp), lambda i: (0, 0)),
            pl.BlockSpec((F, 1), lambda i: (0, 0)),
        ],
        out_specs=pl.BlockSpec((tile_n, F), lambda i: (i, 0)),
        compiler_params=pltpu.CompilerParams(
            dimension_semantics=("parallel",),
            vmem_limit_bytes=32 * 1024 * 1024),
        cost_estimate=cost,
    )(x2d, w3, b3, wlin_p, blin)

    return y2d[:N].reshape(B, T, F)


def _reference(x, w_ih, b_ih, b_hh, w_lin, b_lin):
    H = HIDDEN
    gates = jnp.einsum("btf,gf->btg", x, w_ih) + (b_ih + b_hh)
    i_g = jax.nn.sigmoid(gates[..., 0 * H:1 * H])
    g_g = jnp.tanh(gates[..., 2 * H:3 * H])
    o_g = jax.nn.sigmoid(gates[..., 3 * H:4 * H])
    h = o_g * jnp.tanh(i_g * g_g)
    return jnp.einsum("bth,fh->btf", h, w_lin) + b_lin


if __name__ == "__main__":
    H = HIDDEN
    key = jax.random.PRNGKey(0)
    kx, k1, k2, k3, k4, k5, kx2 = jax.random.split(key, 7)

    B, T, F = 2, 8, 16        # batch, seq, frame_size

    # Deterministic parameter init (PyTorch-style uniform(-1/sqrt(H), 1/sqrt(H))).
    bound = 1.0 / jnp.sqrt(jnp.float32(H))
    w_ih = jax.random.uniform(k1, (4 * H, F), jnp.float32, -bound, bound)  # LSTM weight_ih_l0
    b_ih = jax.random.uniform(k2, (4 * H,), jnp.float32, -bound, bound)    # LSTM bias_ih_l0
    b_hh = jax.random.uniform(k3, (4 * H,), jnp.float32, -bound, bound)    # LSTM bias_hh_l0
    # weight_hh_l0 exists in the module but multiplies h_prev == 0, so it is unused.
    w_lin = jax.random.uniform(k4, (F, H), jnp.float32, -bound, bound)     # Linear weight
    b_lin = jax.random.uniform(k5, (F,), jnp.float32, -bound, bound)       # Linear bias

    gate_dtype = _gate_dtype_for_device()
    tol = 5e-2 if gate_dtype == jnp.bfloat16 else 1e-4

    # Small test (single block).
    x = jax.random.normal(kx, (B, T, F), jnp.float32)
    out = jax.block_until_ready(lstm_forward(x, w_ih, b_ih, b_hh, w_lin, b_lin))
    ref = _reference(x, w_ih, b_ih, b_hh, w_lin, b_lin)
    assert out.shape == (B, T, F)
    assert jnp.allclose(out, ref, rtol=tol, atol=tol), "mismatch vs reference (small)"

    # Exercise the multi-block + ragged-tail path (grid > 1, N % TILE_N != 0).
    B2, T2 = 3, 1000          # N = 3000 -> grid of 2 with a ragged last block
    x2 = jax.random.normal(kx2, (B2, T2, F), jnp.float32)
    out2 = jax.block_until_ready(lstm_forward(x2, w_ih, b_ih, b_hh, w_lin, b_lin))
    ref2 = _reference(x2, w_ih, b_ih, b_hh, w_lin, b_lin)
    assert out2.shape == (B2, T2, F)
    assert jnp.allclose(out2, ref2, rtol=tol, atol=tol), "mismatch vs reference (tiled)"

    print("KERNEL_OK")
</pallas_src>

<mosaic_0001>
module attributes {stable_mosaic.version = 11 : i64} {
  func.func @_lstm_fused_kernel(%arg0: i32, %arg1: memref<128x16xf32, #tpu.memory_space<vmem>>, %arg2: memref<168x16xf32, #tpu.memory_space<vmem>>, %arg3: memref<168x1xf32, #tpu.memory_space<vmem>>, %arg4: memref<16x56xf32, #tpu.memory_space<vmem>>, %arg5: memref<16x1xf32, #tpu.memory_space<vmem>>, %arg6: memref<128x16xf32, #tpu.memory_space<vmem>>) attributes {dimension_semantics = [#tpu.dimension_semantics<parallel>], iteration_bounds = array<i64: 1>, scalar_prefetch = 0 : i64, scratch_operands = 0 : i64, tpu.core_type = #tpu.core_type<tc>, window_params = [{transform_indices = @transform_0, window_bounds = array<i64: 128, 16>}, {pipeline_mode = #tpu.pipeline_mode<synchronous>, transform_indices = @transform_1, window_bounds = array<i64: 168, 16>}, {pipeline_mode = #tpu.pipeline_mode<synchronous>, transform_indices = @transform_2, window_bounds = array<i64: 168, 1>}, {pipeline_mode = #tpu.pipeline_mode<synchronous>, transform_indices = @transform_3, window_bounds = array<i64: 16, 56>}, {pipeline_mode = #tpu.pipeline_mode<synchronous>, transform_indices = @transform_4, window_bounds = array<i64: 16, 1>}, {transform_indices = @transform_5, window_bounds = array<i64: 128, 16>}]} {
    %c0 = arith.constant 0 : index
    %c0_0 = arith.constant 0 : index
    %0 = vector.load %arg1[%c0, %c0_0] : memref<128x16xf32, #tpu.memory_space<vmem>>, vector<128x16xf32>
    %c0_1 = arith.constant 0 : index
    %c0_2 = arith.constant 0 : index
    %1 = vector.load %arg2[%c0_1, %c0_2] : memref<168x16xf32, #tpu.memory_space<vmem>>, vector<56x16xf32>
    %c0_3 = arith.constant 0 : index
    %c0_4 = arith.constant 0 : index
    %2 = vector.load %arg3[%c0_3, %c0_4] : memref<168x1xf32, #tpu.memory_space<vmem>>, vector<56x1xf32>
    %cst = arith.constant dense<0.000000e+00> : vector<56x128xf32>
    %3 = tpu.matmul %1, %0, %cst {dimension_numbers = #tpu.dot_dimension_numbers<[1], [1], [0], [0], [0, 0, 1, 0], [], []>} : vector<56x16xf32>, vector<128x16xf32>, vector<56x128xf32> -> vector<56x128xf32>
    %4 = vector.broadcast %2 : vector<56x1xf32> to vector<56x128xf32>
    %5 = arith.addf %3, %4 : vector<56x128xf32>
    %6 = arith.negf %5 : vector<56x128xf32>
    %7 = math.exp %6 : vector<56x128xf32>
    %cst_5 = arith.constant 1.000000e+00 : f32
    %8 = vector.broadcast %cst_5 : f32 to vector<56x128xf32>
    %9 = arith.addf %8, %7 : vector<56x128xf32>
    %10 = arith.divf %8, %9 : vector<56x128xf32>
    %c56 = arith.constant 56 : index
    %c0_6 = arith.constant 0 : index
    %11 = vector.load %arg2[%c56, %c0_6] : memref<168x16xf32, #tpu.memory_space<vmem>>, vector<56x16xf32>
    %c56_7 = arith.constant 56 : index
    %c0_8 = arith.constant 0 : index
    %12 = vector.load %arg3[%c56_7, %c0_8] : memref<168x1xf32, #tpu.memory_space<vmem>>, vector<56x1xf32>
    %cst_9 = arith.constant dense<0.000000e+00> : vector<56x128xf32>
    %13 = tpu.matmul %11, %0, %cst_9 {dimension_numbers = #tpu.dot_dimension_numbers<[1], [1], [0], [0], [0, 0, 1, 0], [], []>} : vector<56x16xf32>, vector<128x16xf32>, vector<56x128xf32> -> vector<56x128xf32>
    %14 = vector.broadcast %12 : vector<56x1xf32> to vector<56x128xf32>
    %15 = arith.addf %13, %14 : vector<56x128xf32>
    %16 = math.tanh %15 : vector<56x128xf32>
    %c112 = arith.constant 112 : index
    %c0_10 = arith.constant 0 : index
    %17 = vector.load %arg2[%c112, %c0_10] : memref<168x16xf32, #tpu.memory_space<vmem>>, vector<56x16xf32>
    %c112_11 = arith.constant 112 : index
    %c0_12 = arith.constant 0 : index
    %18 = vector.load %arg3[%c112_11, %c0_12] : memref<168x1xf32, #tpu.memory_space<vmem>>, vector<56x1xf32>
    %cst_13 = arith.constant dense<0.000000e+00> : vector<56x128xf32>
    %19 = tpu.matmul %17, %0, %cst_13 {dimension_numbers = #tpu.dot_dimension_numbers<[1], [1], [0], [0], [0, 0, 1, 0], [], []>} : vector<56x16xf32>, vector<128x16xf32>, vector<56x128xf32> -> vector<56x128xf32>
    %20 = vector.broadcast %18 : vector<56x1xf32> to vector<56x128xf32>
    %21 = arith.addf %19, %20 : vector<56x128xf32>
    %22 = arith.negf %21 : vector<56x128xf32>
    %23 = math.exp %22 : vector<56x128xf32>
    %cst_14 = arith.constant 1.000000e+00 : f32
    %24 = vector.broadcast %cst_14 : f32 to vector<56x128xf32>
    %25 = arith.addf %24, %23 : vector<56x128xf32>
    %26 = arith.divf %24, %25 : vector<56x128xf32>
    %27 = arith.mulf %10, %16 : vector<56x128xf32>
    %28 = math.tanh %27 : vector<56x128xf32>
    %29 = arith.mulf %26, %28 : vector<56x128xf32>
    %c0_15 = arith.constant 0 : index
    %c0_16 = arith.constant 0 : index
    %30 = vector.load %arg4[%c0_15, %c0_16] : memref<16x56xf32, #tpu.memory_space<vmem>>, vector<16x56xf32>
    %cst_17 = arith.constant dense<0.000000e+00> : vector<16x128xf32>
    %31 = tpu.matmul %30, %29, %cst_17 {dimension_numbers = #tpu.dot_dimension_numbers<[1], [0], [0], [1], [0, 0, 1, 1], [], []>} : vector<16x56xf32>, vector<56x128xf32>, vector<16x128xf32> -> vector<16x128xf32>
    %c0_18 = arith.constant 0 : index
    %c0_19 = arith.constant 0 : index
    %32 = vector.load %arg5[%c0_18, %c0_19] : memref<16x1xf32, #tpu.memory_space<vmem>>, vector<16x1xf32>
    %33 = vector.broadcast %32 : vector<16x1xf32> to vector<16x128xf32>
    %34 = arith.addf %31, %33 : vector<16x128xf32>
    %35 = tpu.transpose %34, [1, 0] : vector<16x128xf32> -> vector<128x16xf32>
    %c0_20 = arith.constant 0 : index
    %c0_21 = arith.constant 0 : index
    %36 = vector.load %arg6[%c0_20, %c0_21] : memref<128x16xf32, #tpu.memory_space<vmem>>, vector<128x16xf32>
    tpu.vector_store %arg6[%c0_20, %c0_21], %35 {strides = array<i32>} : memref<128x16xf32, #tpu.memory_space<vmem>>, vector<128x16xf32>,
    return
  }
  func.func @transform_0(%arg0: i32) -> (i32, i32) {
    %c0_i32 = arith.constant 0 : i32
    %c0_i32_0 = arith.constant 0 : i32
    return %arg0, %c0_i32 : i32, i32
  }
  func.func @transform_1(%arg0: i32) -> (i32, i32) {
    %c0_i32 = arith.constant 0 : i32
    %c0_i32_0 = arith.constant 0 : i32
    %c0_i32_1 = arith.constant 0 : i32
    return %c0_i32, %c0_i32_0 : i32, i32
  }
  func.func @transform_2(%arg0: i32) -> (i32, i32) {
    %c0_i32 = arith.constant 0 : i32
    %c0_i32_0 = arith.constant 0 : i32
    %c0_i32_1 = arith.constant 0 : i32
    return %c0_i32, %c0_i32_0 : i32, i32
  }
  func.func @transform_3(%arg0: i32) -> (i32, i32) {
    %c0_i32 = arith.constant 0 : i32
    %c0_i32_0 = arith.constant 0 : i32
    %c0_i32_1 = arith.constant 0 : i32
    return %c0_i32, %c0_i32_0 : i32, i32
  }
  func.func @transform_4(%arg0: i32) -> (i32, i32) {
    %c0_i32 = arith.constant 0 : i32
    %c0_i32_0 = arith.constant 0 : i32
    %c0_i32_1 = arith.constant 0 : i32
    return %c0_i32, %c0_i32_0 : i32, i32
  }
  func.func @transform_5(%arg0: i32) -> (i32, i32) {
    %c0_i32 = arith.constant 0 : i32
    %c0_i32_0 = arith.constant 0 : i32
    return %arg0, %c0_i32 : i32, i32
  }
}

</mosaic_0001>

<bundles_post_ra>
// kernel: tpu_custom_call.1
= control target key start
LH: loop header
LB: loop body
LE: loop exit
PB: predicated region body
PF: predicated region fallthrough
CT: control target
= control target key end

     0   :  { %vm85_vm0 = vcmask 130048   ;;  %v1392_v0 = vmov 0.0|0.0   ;;  %vm1393_vm2 = vmmov 0   ;;  %v1394_v5 = vmov 0.0   ;;  %s1889_s0 = inlined_call_operand.vmem [shape: f32[128,16], index: 0, kind: input, shape index: {}]   ;;  %s1890_s2 = inlined_call_operand.vmem [shape: f32[168,1], index: 2, kind: input, shape index: {}]   ;;  %s1891_s4 = inlined_call_operand.vmem [shape: f32[16,1], index: 4, kind: input, shape index: {}]   ;;  %s1892_s1 = inlined_call_operand.vmem [shape: f32[168,16], index: 1, kind: input, shape index: {}]   ;;  %s1893_s3 = inlined_call_operand.vmem [shape: f32[16,56], index: 3, kind: input, shape index: {}]   ;;  %s1894_s5 = inlined_call_operand.vmem [shape: f32[128,16], index: 5, kind: output, shape index: {}]  }
   0x1   :  { %1194 = vmatprep.subr.bf16.mxu0 %v1392_v0  ;;  %v20_v1 = vld [vmem:[%s1889_s0] sm:$0xff]  ;;  %v21_v2 = vld [vmem:[%s1889_s0 + $0x8] sm:$0xff]  ;;  %vm1435_vm1 = vmpackc.low %vm85_vm0, %vm85_vm0  ;;  %1226 = vmatprep.subr.bf16.mxu1 %v1392_v0  ;;  %v1395_v15 = vmov 0   ;;  %vm721_vm3 = vcmask 457728  }
   0x2   :  { %v1440_v4 = vpack.c.bf16 %v21_v2, %v20_v1  ;;  %1050 = vmatprep.mubr.msk.f32.mxu0 %vm1393_vm2, %v1394_v5  ;;  %1103 = vmatprep.mubr.msk.f32.mxu1 %vm1393_vm2, %v1394_v5  ;;  %v22_v6 = vld [vmem:[%s1889_s0 + $0x10] sm:$0xff]  ;;  %v23_v7 = vld [vmem:[%s1889_s0 + $0x18] sm:$0xff]  ;;  %v24_v9 = vld [vmem:[%s1889_s0 + $0x20] sm:$0xff] }
   0x3   :  { %v1460_v8 = vpack.c.bf16 %v23_v7, %v22_v6  ;;  %v25_v10 = vld [vmem:[%s1889_s0 + $0x28] sm:$0xff]  ;;  %v26_v12 = vld [vmem:[%s1889_s0 + $0x30] sm:$0xff]  ;;  %v27_v13 = vld [vmem:[%s1889_s0 + $0x38] sm:$0xff]  ;;  %1307 = vset.pattern.permute.xlu1 %v1395_v15  ;;  %1306 = vset.pattern.permute.xlu0 %v1395_v15 }
   0x4   :  { %1197 = vmatpush3.bf16.xpose.msk.msra.mxu0 %vm1435_vm1, %v1440_v4  ;;  %1229 = vmatpush3.bf16.xpose.msk.msra.mxu1 %vm1435_vm1, %v1440_v4  ;;  %v1476_v11 = vpack.c.bf16 %v25_v10, %v24_v9  ;;  %v45_v14 = vld [vmem:[%s1890_s2 + $0x10] sm:$0xff]  ;;  %v43_v16 = vld [vmem:[%s1890_s2] sm:$0xff]  ;;  %v1498_v17 = vpack.c.bf16 %v27_v13, %v26_v12  ;;  %v46_v18 = vld [vmem:[%s1890_s2 + $0x18] sm:$0xff] }
   0x5   :  { %1198 = vmatprep.subr.bf16.mxu0 %v1392_v0  ;;  %1230 = vmatprep.subr.bf16.mxu1 %v1392_v0  ;;  %v44_v19 = vld [vmem:[%s1890_s2 + $0x8] sm:$0xff]  ;;  %v28_v21 = vld [vmem:[%s1889_s0 + $0x40] sm:$0xff]  ;;  %v482_v25 = vld [vmem:[%s1890_s2 + $0x78] sm:$0xff] }
   0x6   :  { %62 = vperm.xlu1 %1307, %v45_v14   ;;  %52 = vperm.xlu0 %1306, %v43_v16   ;;  %v48_v20 = vld [vmem:[%s1890_s2 + $0x28] sm:$0xff]  ;;  %v47_v23 = vld [vmem:[%s1890_s2 + $0x20] sm:$0xff]  ;;  %v481_v26 = vld [vmem:[%s1890_s2 + $0x70] sm:$0xff] }
   0x7   :  { %v29_v22 = vld [vmem:[%s1889_s0 + $0x48] sm:$0xff]  ;;  %v304_v27 = vld [vmem:[%s1890_s2 + $0x38] sm:$0xff]  ;;  %v30_v28 = vld [vmem:[%s1889_s0 + $0x50] sm:$0xff] }
   0x8   :  { %v1526_v24 = vpack.c.bf16 %v29_v22, %v28_v21  ;;  %v31_v29 = vld [vmem:[%s1889_s0 + $0x58] sm:$0xff]  ;;  %v49_v30 = vld [vmem:[%s1890_s2 + $0x30] sm:$0xff]  ;;  %v483_v32 = vld [vmem:[%s1890_s2 + $0x80] sm:$0xff] }
   0x9   :  { %v1554_v31 = vpack.c.bf16 %v31_v29, %v30_v28  ;;  %v305_v33 = vld [vmem:[%s1890_s2 + $0x40] sm:$0xff]  ;;  %v306_v34 = vld [vmem:[%s1890_s2 + $0x48] sm:$0xff]  ;;  %v485_v39 = vld [vmem:[%s1890_s2 + $0x90] sm:$0xff] }
   0xa   :  { %67 = vperm.xlu1 %1307, %v46_v18   ;;  %57 = vperm.xlu0 %1306, %v44_v19   ;;  %v32_v35 = vld [vmem:[%s1889_s0 + $0x60] sm:$0xff]  ;;  %v33_v36 = vld [vmem:[%s1889_s0 + $0x68] sm:$0xff]  ;;  %v307_v40 = vld [vmem:[%s1890_s2 + $0x50] sm:$0xff] }
   0xb   :  { %v484_v37 = vld [vmem:[%s1890_s2 + $0x88] sm:$0xff]  ;;  %v1582_v38 = vpack.c.bf16 %v33_v36, %v32_v35  ;;  %v308_v41 = vld [vmem:[%s1890_s2 + $0x58] sm:$0xff]  ;;  %v34_v42 = vld [vmem:[%s1889_s0 + $0x70] sm:$0xff] }
   0xc   :  { %1201 = vmatpush3.bf16.xpose.msk.msra.mxu0 %vm1435_vm1, %v1460_v8  ;;  %1233 = vmatpush3.bf16.xpose.msk.msra.mxu1 %vm1435_vm1, %v1460_v8  ;;  %v35_v43 = vld [vmem:[%s1889_s0 + $0x78] sm:$0xff]  ;;  %v487_v46 = vld [vmem:[%s1890_s2 + $0xa0] sm:$0xff]  ;;  %v310_v49 = vld [vmem:[%s1890_s2 + $0x68] sm:$0xff] }
   0xd   :  { %1202 = vmatprep.subr.bf16.mxu0 %v1392_v0  ;;  %1234 = vmatprep.subr.bf16.mxu1 %v1392_v0  ;;  %v486_v44 = vld [vmem:[%s1890_s2 + $0x98] sm:$0xff]  ;;  %v1610_v45 = vpack.c.bf16 %v35_v43, %v34_v42  ;;  %v309_v47 = vld [vmem:[%s1890_s2 + $0x60] sm:$0xff]  ;;  %v710_v52 = vld [vmem:[%s1891_s4 + $0x8] sm:$0xff] }
   0xe   :  { %77 = vperm.xlu1 %1307, %v48_v20   ;;  %72 = vperm.xlu0 %1306, %v47_v23   ;;  %v709_v48 = vld [vmem:[%s1891_s4] sm:$0xff]  ;;  %v297_v51 = vld [vmem:[%s1892_s1 + $0x38] sm:$0xff]  ;;  %v37_v53 = vld [vmem:[%s1892_s1 + $0x8] sm:$0xff] }
   0xf   :  { %v36_v50 = vld [vmem:[%s1892_s1] sm:$0xff]  ;;  %v38_v55 = vld [vmem:[%s1892_s1 + $0x10] sm:$0xff]  ;;  %v299_v56 = vld [vmem:[%s1892_s1 + $0x48] sm:$0xff] }
  0x10   :  { %v298_v54 = vld [vmem:[%s1892_s1 + $0x40] sm:$0xff]  ;;  %v39_v57 = vld [vmem:[%s1892_s1 + $0x18] sm:$0xff]  ;;  %v300_v58 = vld [vmem:[%s1892_s1 + $0x50] sm:$0xff] }
  0x11   :  { %v40_v59 = vld [vmem:[%s1892_s1 + $0x20] sm:$0xff]  ;;  %v301_v60 = vld [vmem:[%s1892_s1 + $0x58] sm:$0xff]  ;;  %v41_v61 = vld [vmem:[%s1892_s1 + $0x28] sm:$0xff] }
  0x12   :  { %495 = vperm.xlu1 %1307, %v482_v25   ;;  %490 = vperm.xlu0 %1306, %v481_v26   ;;  %v302_v62 = vld [vmem:[%s1892_s1 + $0x60] sm:$0xff]  ;;  %v42_v63 = vld [vmem:[%s1892_s1 + $0x30] sm:$0xff]  ;;  %v303_v1 = vld [vmem:[%s1892_s1 + $0x68] sm:$0xff] }
  0x13   :  { %v474_v2 = vld [vmem:[%s1892_s1 + $0x70] sm:$0xff]  ;;  %v477_v3 = vld [vmem:[%s1892_s1 + $0x88] sm:$0xff]  ;;  %v479_v7 = vld [vmem:[%s1892_s1 + $0x98] sm:$0xff] }
  0x14   :  { %1205 = vmatpush3.bf16.xpose.msk.msra.mxu0 %vm1435_vm1, %v1476_v11  ;;  %1237 = vmatpush3.bf16.xpose.msk.msra.mxu1 %vm1435_vm1, %v1476_v11  ;;  %v478_v6 = vld [vmem:[%s1892_s1 + $0x90] sm:$0xff] }
  0x15   :  { %1206 = vmatprep.subr.bf16.mxu0 %v1392_v0  ;;  %1238 = vmatprep.subr.bf16.mxu1 %v1392_v0 }
  0x16   :  { %313 = vperm.xlu1 %1307, %v304_v27   ;;  %82 = vperm.xlu0 %1306, %v49_v30  }
  0x1a   :  { %500 = vperm.xlu1 %1307, %v483_v32   ;;  %318 = vperm.xlu0 %1306, %v305_v33  }
  0x1c   :  { %1209 = vmatpush3.bf16.xpose.msk.msra.mxu0 %vm1435_vm1, %v1498_v17  ;;  %1241 = vmatpush3.bf16.xpose.msk.msra.mxu1 %vm1435_vm1, %v1498_v17 }
  0x1d   :  { %1210 = vmatprep.subr.bf16.mxu0 %v1392_v0  ;;  %1242 = vmatprep.subr.bf16.mxu1 %v1392_v0 }
  0x1e   :  { %323 = vperm.xlu1 %1307, %v306_v34   ;;  %505 = vperm.xlu0 %1306, %v484_v37  }
  0x22   :  { %510 = vperm.xlu1 %1307, %v485_v39   ;;  %328 = vperm.xlu0 %1306, %v307_v40  }
  0x24   :  { %1213 = vmatpush3.bf16.xpose.msk.msra.mxu0 %vm1435_vm1, %v1526_v24  ;;  %1245 = vmatpush3.bf16.xpose.msk.msra.mxu1 %vm1435_vm1, %v1526_v24 }
  0x25   :  { %1214 = vmatprep.subr.bf16.mxu0 %v1392_v0  ;;  %1246 = vmatprep.subr.bf16.mxu1 %v1392_v0 }
  0x26   :  { %333 = vperm.xlu1 %1307, %v308_v41   ;;  %515 = vperm.xlu0 %1306, %v486_v44  }
  0x2a   :  { %520 = vperm.xlu1 %1307, %v487_v46   ;;  %338 = vperm.xlu0 %1306, %v309_v47  }
  0x2c   :  { %1217 = vmatpush3.bf16.xpose.msk.msra.mxu0 %vm1435_vm1, %v1554_v31  ;;  %1249 = vmatpush3.bf16.xpose.msk.msra.mxu1 %vm1435_vm1, %v1554_v31 }
  0x2d   :  { %1218 = vmatprep.subr.bf16.mxu0 %v1392_v0  ;;  %1250 = vmatprep.subr.bf16.mxu1 %v1392_v0 }
  0x2e   :  { %713 = vperm.xlu1 %1307, %v709_v48   ;;  %343 = vperm.xlu0 %1306, %v310_v49  }
  0x32   :  { %718 = vperm.xlu0 %1306, %v710_v52  }
  0x34   :  { %1221 = vmatpush3.bf16.xpose.msk.msra.mxu0 %vm1435_vm1, %v1582_v38  ;;  %1253 = vmatpush3.bf16.xpose.msk.msra.mxu1 %vm1435_vm1, %v1582_v38 }
  0x35   :  { %1222 = vmatprep.subr.bf16.mxu0 %v1392_v0  ;;  %1254 = vmatprep.subr.bf16.mxu1 %v1392_v0 }
  0x3c   :  { %1225 = vmatpush3.bf16.xpose.msk.msra.mxu0 %vm1435_vm1, %v1610_v45  ;;  %1257 = vmatpush3.bf16.xpose.msk.msra.mxu1 %vm1435_vm1, %v1610_v45 }
  0x3d   :  { %1258 = vmatprep.subr.bf16.mxu0 %v1392_v0 }
  0x43   :  { %1051 = vmatmul.mubr.msk.f32.vlgmr.msra.gmra.mrb[0].mxu0 %vm85_vm0, %v36_v50  ;;  %1104 = vmatmul.mubr.msk.f32.vlgmr.msra.gmra.mrb[0].mxu1 %vm85_vm0, %v297_v51 }
  0x44   :  { %1261 = vmatpush3.bf16.xpose.msk.msra.mxu0 %vm1435_vm1, %v1440_v4  ;;  %1053 = vmatprep.mubr.msk.f32.mxu0 %vm1393_vm2, %v1394_v5  ;;  %v475_v4 = vld [vmem:[%s1892_s1 + $0x78] sm:$0xff] }
  0x45   :  { %1262 = vmatprep.subr.bf16.mxu0 %v1392_v0  ;;  %1106 = vmatprep.mubr.msk.f32.mxu1 %vm1393_vm2, %v1394_v5 }
  0x47   :  { %1054 = vmatmul.mubr.msk.f32.gmra.mrb[2].mxu0 %vm85_vm0, %v37_v53  ;;  %1107 = vmatmul.mubr.msk.f32.gmra.mrb[2].mxu1 %vm85_vm0, %v298_v54 }
  0x48   :  { %1056 = vmatprep.mubr.msk.f32.mxu0 %vm1393_vm2, %v1394_v5  ;;  %1109 = vmatprep.mubr.msk.f32.mxu1 %vm1393_vm2, %v1394_v5 }
  0x4b   :  { %1057 = vmatmul.mubr.msk.f32.gmra.mrb[4].mxu0 %vm85_vm0, %v38_v55  ;;  %1110 = vmatmul.mubr.msk.f32.gmra.mrb[4].mxu1 %vm85_vm0, %v299_v56 }
  0x4c   :  { %1265 = vmatpush3.bf16.xpose.msk.msra.mxu0 %vm1435_vm1, %v1460_v8  ;;  %1059 = vmatprep.mubr.msk.f32.mxu0 %vm1393_vm2, %v1394_v5  ;;  %v480_v8 = vld [vmem:[%s1892_s1 + $0xa0] sm:$0xff] }
  0x4d   :  { %1266 = vmatprep.subr.bf16.mxu0 %v1392_v0  ;;  %1112 = vmatprep.mubr.msk.f32.mxu1 %vm1393_vm2, %v1394_v5 }
  0x4f   :  { %1060 = vmatmul.mubr.msk.f32.gmra.mrb[6].mxu0 %vm85_vm0, %v39_v57  ;;  %1113 = vmatmul.mubr.msk.f32.gmra.mrb[6].mxu1 %vm85_vm0, %v300_v58 }
  0x50   :  { %1062 = vmatprep.mubr.msk.f32.mxu0 %vm1393_vm2, %v1394_v5  ;;  %1115 = vmatprep.mubr.msk.f32.mxu1 %vm1393_vm2, %v1394_v5 }
  0x53   :  { %1063 = vmatmul.mubr.msk.f32.gmra.mrb[8].mxu0 %vm85_vm0, %v40_v59  ;;  %1116 = vmatmul.mubr.msk.f32.gmra.mrb[8].mxu1 %vm85_vm0, %v301_v60 }
  0x54   :  { %1269 = vmatpush3.bf16.xpose.msk.msra.mxu0 %vm1435_vm1, %v1476_v11  ;;  %1065 = vmatprep.mubr.msk.f32.mxu0 %vm1393_vm2, %v1394_v5 }
  0x55   :  { %1270 = vmatprep.subr.bf16.mxu0 %v1392_v0  ;;  %1118 = vmatprep.mubr.msk.f32.mxu1 %vm1393_vm2, %v1394_v5 }
  0x57   :  { %1066 = vmatmul.mubr.msk.f32.gmra.mrb[10].mxu0 %vm85_vm0, %v41_v61  ;;  %1119 = vmatmul.mubr.msk.f32.gmra.mrb[10].mxu1 %vm85_vm0, %v302_v62 }
  0x58   :  { %1068 = vmatprep.mubr.msk.f32.mxu0 %vm1393_vm2, %v1394_v5  ;;  %1121 = vmatprep.mubr.msk.f32.mxu1 %vm1393_vm2, %v1394_v5 }
  0x5b   :  { %1069 = vmatmul.mubr.msk.f32.gmra.mrb[12].mxu0 %vm85_vm0, %v42_v63  ;;  %1122 = vmatmul.mubr.msk.f32.gmra.mrb[12].mxu1 %vm85_vm0, %v303_v1 }
  0x5c   :  { %1273 = vmatpush3.bf16.xpose.msk.msra.mxu0 %vm1435_vm1, %v1498_v17  ;;  %1156 = vmatprep.mubr.msk.f32.mxu0 %vm1393_vm2, %v1394_v5 }
  0x5d   :  { %1274 = vmatprep.subr.bf16.mxu0 %v1392_v0 }
  0x64   :  { %1277 = vmatpush3.bf16.xpose.msk.msra.mxu0 %vm1435_vm1, %v1526_v24 }
  0x65   :  { %1278 = vmatprep.subr.bf16.mxu0 %v1392_v0 }
  0x6c   :  { %1281 = vmatpush3.bf16.xpose.msk.msra.mxu0 %vm1435_vm1, %v1554_v31 }
  0x6d   :  { %1282 = vmatprep.subr.bf16.mxu0 %v1392_v0 }
  0x74   :  { %1285 = vmatpush3.bf16.xpose.msk.msra.mxu0 %vm1435_vm1, %v1582_v38 }
  0x75   :  { %1286 = vmatprep.subr.bf16.mxu0 %v1392_v0  ;;  %v476_v0 = vld [vmem:[%s1892_s1 + $0x80] sm:$0xff] }
  0x7c   :  { %1289 = vmatpush3.bf16.xpose.msk.msra.mxu0 %vm1435_vm1, %v1610_v45 }
  0x83   :  { %1157 = vmatmul.mubr.msk.f32.vlgmr.msra.gmra.mrb[14].mxu0 %vm85_vm0, %v474_v2 }
  0x84   :  { %1159 = vmatprep.mubr.msk.f32.mxu0 %vm1393_vm2, %v1394_v5 }
  0x85   :  { %v53_v9 = vpop.permute.xlu0 %52  ;;  %v63_v10 = vpop.permute.xlu1 %62 }
  0x87   :  { %1160 = vmatmul.mubr.msk.f32.gmra.mrb[16].mxu0 %vm85_vm0, %v475_v4 }
  0x88   :  { %1162 = vmatprep.mubr.msk.f32.mxu0 %vm1393_vm2, %v1394_v5 }
  0x89   :  { %v58_v11 = vpop.permute.xlu0 %57  ;;  %v68_v12 = vpop.permute.xlu1 %67 }
  0x8b   :  { %1163 = vmatmul.mubr.msk.f32.gmra.mrb[18].mxu0 %vm85_vm0, %v476_v0 }
  0x8c   :  { %1165 = vmatprep.mubr.msk.f32.mxu0 %vm1393_vm2, %v1394_v5 }
  0x8d   :  { %v73_v13 = vpop.permute.xlu0 %72  ;;  %v78_v14 = vpop.permute.xlu1 %77 }
  0x8f   :  { %1166 = vmatmul.mubr.msk.f32.gmra.mrb[20].mxu0 %vm85_vm0, %v477_v3 }
  0x90   :  { %1168 = vmatprep.mubr.msk.f32.mxu0 %vm1393_vm2, %v1394_v5 }
  0x91   :  { %v1787_v15 = vpop.permute.xlu0 %490  ;;  %v1789_v16 = vpop.permute.xlu1 %495 }
  0x93   :  { %1169 = vmatmul.mubr.msk.f32.gmra.mrb[22].mxu0 %vm85_vm0, %v478_v6 }
  0x94   :  { %1171 = vmatprep.mubr.msk.f32.mxu0 %vm1393_vm2, %v1394_v5 }
  0x95   :  { %v1791_v17 = vpop.permute.xlu0 %82  ;;  %v314_v18 = vpop.permute.xlu1 %313 }
  0x97   :  { %1172 = vmatmul.mubr.msk.f32.gmra.mrb[24].mxu0 %vm85_vm0, %v479_v7 }
  0x98   :  { %1174 = vmatprep.mubr.msk.f32.mxu0 %vm1393_vm2, %v1394_v5  ;;  %v707_v5 = vld [vmem:[%s1893_s3] sm:$0xff] }
  0x99   :  { %1191 = vmatprep.mubr.msk.f32.mxu1 %vm721_vm3, %v707_v5  ;;  %v319_v19 = vpop.permute.xlu0 %318  ;;  %v1797_v26 = vpop.permute.xlu1 %500 }
  0x9b   :  { %1175 = vmatmul.mubr.msk.f32.gmra.mrb[26].mxu0 %vm85_vm0, %v480_v8 }
  0x9d   :  { %v1799_v33 = vpop.permute.xlu0 %505  ;;  %v324_v40 = vpop.permute.xlu1 %323 }
  0xa1   :  { %v329_v49 = vpop.permute.xlu0 %328  ;;  %v1801_v59 = vpop.permute.xlu1 %510 }
  0xa5   :  { %v1803_v6 = vpop.permute.xlu0 %515 }
 0x116   :  { %v221_v20 = vpop.f32.mrb[0].mxu0  ;;  %v433_v21 = vpop.f32.mrb[0].mxu1 }
 0x117   :  { %v222_v22 = vadd.f32 %v221_v20, %v53_v9  ;;  %v1052_v23 = vpop.f32.mrb[1].mxu0  ;;  %v1105_v24 = vpop.f32.mrb[1].mxu1  ;;  %v434_v41 = vadd.f32 %v433_v21, %v314_v18 }
 0x118   :  { %v339_v24 = vpop.permute.xlu0 %338 }
 0x119   :  { %v878_v25 = vmul.f32 -1.442695, %v222_v22 }
 0x11a   :  { %v226_v27 = vpop.f32.mrb[2].mxu0  ;;  %v438_v28 = vpop.f32.mrb[2].mxu1 }
 0x11b   :  { %1308 = vpow2.f32 %v878_v25  ;;  %v227_v29 = vadd.f32 %v226_v27, %v58_v11  ;;  %v1055_v30 = vpop.f32.mrb[3].mxu0  ;;  %v1108_v31 = vpop.f32.mrb[3].mxu1  ;;  %v439_v52 = vadd.f32 %v438_v28, %v319_v19 }
 0x11c   :  { %v334_v19 = vpop.permute.xlu1 %333 }
 0x11d   :  { %v879_v32 = vmul.f32 -1.442695, %v227_v29 }
 0x11e   :  { %v231_v34 = vpop.f32.mrb[4].mxu0  ;;  %v443_v35 = vpop.f32.mrb[4].mxu1 }
 0x11f   :  { %1310 = vpow2.f32 %v879_v32  ;;  %v232_v36 = vadd.f32 %v231_v34, %v63_v10  ;;  %v1058_v37 = vpop.f32.mrb[5].mxu0  ;;  %v1111_v38 = vpop.f32.mrb[5].mxu1  ;;  %v444_v62 = vadd.f32 %v443_v35, %v324_v40 }
 0x120   :  { %v344_v34 = vpop.permute.xlu0 %343 }
 0x121   :  { %v880_v39 = vmul.f32 -1.442695, %v232_v36 }
 0x122   :  { %v236_v42 = vpop.f32.mrb[6].mxu0  ;;  %v448_v43 = vpop.f32.mrb[6].mxu1 }
 0x123   :  { %1312 = vpow2.f32 %v880_v39  ;;  %v237_v44 = vadd.f32 %v236_v42, %v68_v12  ;;  %v1061_v45 = vpop.f32.mrb[7].mxu0  ;;  %v1114_v46 = vpop.f32.mrb[7].mxu1  ;;  %v449_v9 = vadd.f32 %v448_v43, %v329_v49 }
 0x124   :  { %1314 = vtanh.f32 %v434_v41 }
 0x125   :  { %v1309_v47 = vpop.eup %1308  ;;  %v881_v48 = vmul.f32 -1.442695, %v237_v44 }
 0x126   :  { %v276_v50 = vadd.f32 1.0, %v1309_v47  ;;  %v241_v51 = vpop.f32.mrb[8].mxu0  ;;  %v453_v53 = vpop.f32.mrb[8].mxu1 }
 0x127   :  { %1316 = vpow2.f32 %v881_v48  ;;  %v242_v54 = vadd.f32 %v241_v51, %v73_v13  ;;  %v1064_v55 = vpop.f32.mrb[9].mxu0  ;;  %v1117_v56 = vpop.f32.mrb[9].mxu1  ;;  %v454_v22 = vadd.f32 %v453_v53, %v334_v19 }
 0x128   :  { %1318 = vrcp.f32 %v276_v50  ;;  %v521_v19 = vpop.permute.xlu1 %520 }
 0x129   :  { %v1311_v57 = vpop.eup %1310  ;;  %v882_v58 = vmul.f32 -1.442695, %v242_v54  ;;  %1320 = vtanh.f32 %v439_v52 }
 0x12a   :  { %v277_v60 = vadd.f32 1.0, %v1311_v57  ;;  %v246_v61 = vpop.f32.mrb[10].mxu0  ;;  %v458_v63 = vpop.f32.mrb[10].mxu1 }
 0x12b   :  { %1322 = vpow2.f32 %v882_v58  ;;  %v247_v1 = vadd.f32 %v246_v61, %v78_v14  ;;  %v1067_v2 = vpop.f32.mrb[11].mxu0  ;;  %v1120_v4 = vpop.f32.mrb[11].mxu1 }
 0x12c   :  { %1324 = vrcp.f32 %v277_v60 }
 0x12d   :  { %v1313_v0 = vpop.eup %1312  ;;  %v883_v3 = vmul.f32 -1.442695, %v247_v1  ;;  %1326 = vtanh.f32 %v444_v62 }
 0x12e   :  { %v278_v7 = vadd.f32 1.0, %v1313_v0  ;;  %v251_v8 = vpop.f32.mrb[12].mxu0  ;;  %v463_v10 = vpop.f32.mrb[12].mxu1 }
 0x12f   :  { %1328 = vpow2.f32 %v883_v3  ;;  %v252_v11 = vadd.f32 %v251_v8, %v1791_v17  ;;  %v1070_v12 = vpop.f32.mrb[13].mxu0  ;;  %v1123_v13 = vpop.f32.mrb[13].mxu1  ;;  %v459_v17 = vadd.f32 %v458_v63, %v339_v24  ;;  %v464_v37 = vadd.f32 %v463_v10, %v344_v34 }
 0x130   :  { %v1315_v5 = vpop.eup %1314  ;;  %1330 = vrcp.f32 %v278_v7 }
 0x131   :  { %v1317_v14 = vpop.eup %1316  ;;  %v884_v18 = vmul.f32 -1.442695, %v252_v11  ;;  %1332 = vtanh.f32 %v449_v9 }
 0x132   :  { %v1319_v20 = vpop.eup %1318  ;;  %v279_v21 = vadd.f32 1.0, %v1317_v14 }
 0x133   :  { %v686_v23 = vmul.f32 %v1319_v20, %v1315_v5  ;;  %1334 = vpow2.f32 %v884_v18  ;;  %v1321_v25 = vpop.eup %1320 }
 0x134   :  { %1336 = vrcp.f32 %v279_v21 }
 0x135   :  { %v1323_v27 = vpop.eup %1322  ;;  %1338 = vtanh.f32 %v454_v22 }
 0x136   :  { %v1325_v28 = vpop.eup %1324  ;;  %v280_v29 = vadd.f32 1.0, %v1323_v27 }
 0x137   :  { %v687_v30 = vmul.f32 %v1325_v28, %v1321_v25  ;;  %v1327_v31 = vpop.eup %1326 }
 0x138   :  { %1340 = vrcp.f32 %v280_v29 }
 0x139   :  { %v1329_v32 = vpop.eup %1328  ;;  %1342 = vtanh.f32 %v459_v17 }
 0x13a   :  { %v1331_v35 = vpop.eup %1330  ;;  %v281_v36 = vadd.f32 1.0, %v1329_v32 }
 0x13b   :  { %v688_v38 = vmul.f32 %v1331_v35, %v1327_v31  ;;  %v1333_v39 = vpop.eup %1332 }
 0x13c   :  { %1344 = vrcp.f32 %v281_v36 }
 0x13d   :  { %v1335_v40 = vpop.eup %1334  ;;  %1346 = vtanh.f32 %v464_v37 }
 0x13e   :  { %v1337_v41 = vpop.eup %1336  ;;  %v282_v42 = vadd.f32 1.0, %v1335_v40 }
 0x13f   :  { %v689_v43 = vmul.f32 %v1337_v41, %v1333_v39  ;;  %v1339_v44 = vpop.eup %1338 }
 0x140   :  { %1348 = vrcp.f32 %v282_v42 }
 0x142   :  { %v1341_v45 = vpop.eup %1340 }
 0x143   :  { %v1806_v46 = vmul.f32 %v1341_v45, %v1339_v44  ;;  %v1343_v47 = vpop.eup %1342 }
 0x146   :  { %v1345_v48 = vpop.eup %1344 }
 0x147   :  { %v1808_v49 = vmul.f32 %v1345_v48, %v1343_v47  ;;  %v1347_v50 = vpop.eup %1346 }
 0x14a   :  { %v1349_v51 = vpop.eup %1348 }
 0x14b   :  { %v1810_v52 = vmul.f32 %v1349_v51, %v1347_v50 }
 0x156   :  { %v610_v53 = vpop.f32.mrb[14].mxu0 }
 0x157   :  { %v611_v54 = vadd.f32 %v610_v53, %v1787_v15  ;;  %v1158_v55 = vpop.f32.mrb[15].mxu0 }
 0x159   :  { %v931_v56 = vmul.f32 -1.442695, %v611_v54 }
 0x15a   :  { %v615_v57 = vpop.f32.mrb[16].mxu0 }
 0x15b   :  { %1350 = vpow2.f32 %v931_v56  ;;  %v616_v58 = vadd.f32 %v615_v57, %v1789_v16  ;;  %v1161_v60 = vpop.f32.mrb[17].mxu0 }
 0x15d   :  { %v932_v61 = vmul.f32 -1.442695, %v616_v58  ;;  %v714_v58 = vpop.permute.xlu1 %713 }
 0x15e   :  { %v620_v62 = vpop.f32.mrb[18].mxu0 }
 0x15f   :  { %1352 = vpow2.f32 %v932_v61  ;;  %v621_v63 = vadd.f32 %v620_v62, %v1797_v26  ;;  %v1164_v1 = vpop.f32.mrb[19].mxu0  ;;  %v719_v62 = vpop.permute.xlu0 %718 }
 0x161   :  { %v933_v2 = vmul.f32 -1.442695, %v621_v63 }
 0x162   :  { %v625_v4 = vpop.f32.mrb[20].mxu0 }
 0x163   :  { %1354 = vpow2.f32 %v933_v2  ;;  %v626_v0 = vadd.f32 %v625_v4, %v1799_v33  ;;  %v1167_v3 = vpop.f32.mrb[21].mxu0 }
 0x164   :  { %1356 = vtanh.f32 %v686_v23 }
 0x165   :  { %v1351_v15 = vpop.eup %1350  ;;  %v934_v7 = vmul.f32 -1.442695, %v626_v0 }
 0x166   :  { %v665_v8 = vadd.f32 1.0, %v1351_v15  ;;  %v630_v9 = vpop.f32.mrb[22].mxu0 }
 0x167   :  { %1358 = vpow2.f32 %v934_v7  ;;  %v631_v16 = vadd.f32 %v630_v9, %v1801_v59  ;;  %v1170_v10 = vpop.f32.mrb[23].mxu0 }
 0x168   :  { %1360 = vrcp.f32 %v665_v8 }
 0x169   :  { %v1353_v11 = vpop.eup %1352  ;;  %v935_v12 = vmul.f32 -1.442695, %v631_v16  ;;  %1362 = vtanh.f32 %v687_v30 }
 0x16a   :  { %v666_v26 = vadd.f32 1.0, %v1353_v11  ;;  %v635_v13 = vpop.f32.mrb[24].mxu0 }
 0x16b   :  { %1364 = vpow2.f32 %v935_v12  ;;  %v636_v5 = vadd.f32 %v635_v13, %v1803_v6  ;;  %v1173_v33 = vpop.f32.mrb[25].mxu0 }
 0x16c   :  { %1366 = vrcp.f32 %v666_v26 }
 0x16d   :  { %v1355_v14 = vpop.eup %1354  ;;  %v936_v18 = vmul.f32 -1.442695, %v636_v5  ;;  %1368 = vtanh.f32 %v688_v38 }
 0x16e   :  { %v667_v20 = vadd.f32 1.0, %v1355_v14  ;;  %v640_v21 = vpop.f32.mrb[26].mxu0  ;;  %v1357_v23 = vpop.eup %1356 }
 0x16f   :  { %1370 = vpow2.f32 %v936_v18  ;;  %v641_v59 = vadd.f32 %v640_v21, %v521_v19  ;;  %v1176_v22 = vpop.f32.mrb[27].mxu0 }
 0x170   :  { %1372 = vrcp.f32 %v667_v20 }
 0x171   :  { %v1359_v24 = vpop.eup %1358  ;;  %v937_v25 = vmul.f32 -1.442695, %v641_v59  ;;  %1374 = vtanh.f32 %v689_v43 }
 0x172   :  { %v1361_v27 = vpop.eup %1360  ;;  %v668_v28 = vadd.f32 1.0, %v1359_v24 }
 0x173   :  { %1376 = vpow2.f32 %v937_v25  ;;  %v700_v6 = vmul.f32 %v1361_v27, %v1357_v23  ;;  %v1363_v29 = vpop.eup %1362 }
 0x174   :  { %1378 = vrcp.f32 %v668_v28 }
 0x175   :  { %v1365_v17 = vpop.eup %1364  ;;  %1380 = vtanh.f32 %v1806_v46 }
 0x176   :  { %v1367_v30 = vpop.eup %1366  ;;  %v669_v31 = vadd.f32 1.0, %v1365_v17 }
 0x177   :  { %v701_v32 = vmul.f32 %v1367_v30, %v1363_v29  ;;  %v1369_v34 = vpop.eup %1368 }
 0x178   :  { %1382 = vrcp.f32 %v669_v31 }
 0x179   :  { %v1371_v35 = vpop.eup %1370  ;;  %v1290_v36 = vpack.c.bf16 %v701_v32, %v700_v6  ;;  %1384 = vtanh.f32 %v1808_v49 }
 0x17a   :  { %v1373_v37 = vpop.eup %1372  ;;  %v670_v38 = vadd.f32 1.0, %v1371_v35 }
 0x17b   :  { %1291 = vmatprep.subr.bf16.mxu1 %v1290_v36  ;;  %v702_v39 = vmul.f32 %v1373_v37, %v1369_v34  ;;  %v1375_v40 = vpop.eup %1374 }
 0x17c   :  { %1386 = vrcp.f32 %v670_v38  ;;  %1293 = vmatpush3.bf16.msra.mxu1 %v1290_v36 }
 0x17d   :  { %v1377_v41 = vpop.eup %1376  ;;  %1388 = vtanh.f32 %v1810_v52  ;;  %v708_v52 = vld [vmem:[%s1893_s3 + $0x8] sm:$0xff] }
 0x17e   :  { %v1379_v42 = vpop.eup %1378  ;;  %v671_v43 = vadd.f32 1.0, %v1377_v41 }
 0x17f   :  { %v703_v44 = vmul.f32 %v1379_v42, %v1375_v40  ;;  %v1381_v45 = vpop.eup %1380 }
 0x180   :  { %1390 = vrcp.f32 %v671_v43 }
 0x181   :  { %v1294_v46 = vpack.c.bf16 %v703_v44, %v702_v39 }
 0x182   :  { %v1383_v47 = vpop.eup %1382 }
 0x183   :  { %1295 = vmatprep.subr.bf16.mxu1 %v1294_v46  ;;  %v704_v48 = vmul.f32 %v1383_v47, %v1381_v45  ;;  %v1385_v50 = vpop.eup %1384 }
 0x184   :  { %1297 = vmatpush3.bf16.msra.mxu1 %v1294_v46 }
 0x186   :  { %v1387_v49 = vpop.eup %1386 }
 0x187   :  { %v705_v51 = vmul.f32 %v1387_v49, %v1385_v50  ;;  %v1389_v53 = vpop.eup %1388 }
 0x189   :  { %v1298_v54 = vpack.c.bf16 %v705_v51, %v704_v48 }
 0x18a   :  { %v1391_v55 = vpop.eup %1390 }
 0x18b   :  { %1299 = vmatprep.subr.bf16.mxu1 %v1298_v54  ;;  %v706_v56 = vmul.f32 %v1391_v55, %v1389_v53 }
 0x18c   :  { %1301 = vmatpush3.bf16.msra.mxu1 %v1298_v54 }
 0x18d   :  { %1189 = vmatprep.subr.mxu1 %v706_v56 }
 0x190   :  { %1190 = vmatpush3.msra.mxu1 %v706_v56 }
 0x191   :  { %1192 = vmatmul.mubr.msk.f32.vlgmr.msra.gmra.mrb[14].mxu1 %vm721_vm3, %v708_v52 }
 0x264   :  { %v1193_v57 = vpop.f32.mrb[14].mxu1 }
 0x265   :  { %v794_v60 = vpop.f32.mrb[15].mxu1  ;;  %v800_v63 = vadd.f32 %v1193_v57, %v719_v62 }
 0x266   :  { %v795_v61 = vadd.f32 %v794_v60, %v714_v58 }
 0x268   :  { %803 = vxpose.xlu1.b32.start [1/2] (short) %v795_v61, 128 }
 0x26c   :  { %804 = vxpose.xlu1.b32.end [2/2] (short) %v800_v63, 128 }
 0x2e8   :  { %v819_v1 = vpop.trf.xlu1 }
 0x2e9   :  { %835 = vst.msk [vmem:[%s1894_s5] sm:$0xff] %vm85_vm0, %v819_v1 }
 0x2ec   :  { %v820_v2 = vpop.trf.xlu1 }
 0x2ed   :  { %836 = vst.msk [vmem:[%s1894_s5 + $0x8] sm:$0xff] %vm85_vm0, %v820_v2 }
 0x2f0   :  { %v821_v4 = vpop.trf.xlu1 }
 0x2f1   :  { %837 = vst.msk [vmem:[%s1894_s5 + $0x10] sm:$0xff] %vm85_vm0, %v821_v4 }
 0x2f4   :  { %v822_v0 = vpop.trf.xlu1 }
 0x2f5   :  { %838 = vst.msk [vmem:[%s1894_s5 + $0x18] sm:$0xff] %vm85_vm0, %v822_v0 }
 0x2f8   :  { %v823_v3 = vpop.trf.xlu1 }
 0x2f9   :  { %839 = vst.msk [vmem:[%s1894_s5 + $0x20] sm:$0xff] %vm85_vm0, %v823_v3 }
 0x2fc   :  { %v824_v15 = vpop.trf.xlu1 }
 0x2fd   :  { %840 = vst.msk [vmem:[%s1894_s5 + $0x28] sm:$0xff] %vm85_vm0, %v824_v15 }
 0x300   :  { %v825_v7 = vpop.trf.xlu1 }
 0x301   :  { %841 = vst.msk [vmem:[%s1894_s5 + $0x30] sm:$0xff] %vm85_vm0, %v825_v7 }
 0x304   :  { %v826_v8 = vpop.trf.xlu1 }
 0x305   :  { %842 = vst.msk [vmem:[%s1894_s5 + $0x38] sm:$0xff] %vm85_vm0, %v826_v8 }
 0x308   :  { %v827_v9 = vpop.trf.xlu1 }
 0x309   :  { %843 = vst.msk [vmem:[%s1894_s5 + $0x40] sm:$0xff] %vm85_vm0, %v827_v9 }
 0x30c   :  { %v828_v16 = vpop.trf.xlu1 }
 0x30d   :  { %844 = vst.msk [vmem:[%s1894_s5 + $0x48] sm:$0xff] %vm85_vm0, %v828_v16 }
 0x310   :  { %v829_v10 = vpop.trf.xlu1 }
 0x311   :  { %845 = vst.msk [vmem:[%s1894_s5 + $0x50] sm:$0xff] %vm85_vm0, %v829_v10 }
 0x314   :  { %v830_v11 = vpop.trf.xlu1 }
 0x315   :  { %846 = vst.msk [vmem:[%s1894_s5 + $0x58] sm:$0xff] %vm85_vm0, %v830_v11 }
 0x318   :  { %v831_v12 = vpop.trf.xlu1 }
 0x319   :  { %847 = vst.msk [vmem:[%s1894_s5 + $0x60] sm:$0xff] %vm85_vm0, %v831_v12 }
 0x31c   :  { %v832_v26 = vpop.trf.xlu1 }
 0x31d   :  { %848 = vst.msk [vmem:[%s1894_s5 + $0x68] sm:$0xff] %vm85_vm0, %v832_v26 }
 0x320   :  { %v833_v13 = vpop.trf.xlu1 }
 0x321   :  { %849 = vst.msk [vmem:[%s1894_s5 + $0x70] sm:$0xff] %vm85_vm0, %v833_v13 }
 0x324   :  { %v834_v5 = vpop.trf.xlu1 }
 0x325   :  { %850 = vst.msk [vmem:[%s1894_s5 + $0x78] sm:$0xff] %vm85_vm0, %v834_v5 }

</bundles_post_ra>
